<compile_context>
chip_gen: v6e
topology: v6e:2x2x1
jax: 0.10.0
libtpu: 0.0.40
codegen_flags: <defaults>
</compile_context>

<pallas_src>
import functools

import jax
import jax.numpy as jnp
from jax import lax
from jax.experimental import pallas as pl
from jax.experimental.pallas import tpu as pltpu

LANE = 128


# ----------------------------------------------------------------------------
# Small helpers
# ----------------------------------------------------------------------------
def _vmem_limit_bytes():
    """Generation-aware VMEM budget (v5e/v6e: 128 MiB, v7x: 64 MiB physical)."""
    try:
        cap = int(pltpu.get_tpu_info().vmem_capacity_bytes)
    except Exception:  # query unavailable -> conservative default
        cap = 64 * 1024 * 1024
    return max(32 * 1024 * 1024, (cap * 3) // 4)


def _const_spec(shape):
    """BlockSpec for a grid-constant operand (weights/bias): constant index
    map, single-buffered (no point double-buffering a block that never
    changes across grid steps)."""
    zeros = (0,) * len(shape)
    idx = lambda i: zeros
    try:
        return pl.BlockSpec(shape, idx, pipeline_mode=pl.Buffered(1))
    except TypeError:  # pipeline_mode not supported -> default buffering
        return pl.BlockSpec(shape, idx)


def _pick_batch_tile(batch, rows_per_batch):
    """Batches per grid step: target >=256 flattened M rows per step (fills the
    MXU M dim, amortizes ~0.35us/step overhead); keep the block's leading dim
    a multiple of 8 whenever the grid has more than one step."""
    bblk = min(batch, max(1, pl.cdiv(256, rows_per_batch)))
    while bblk < batch and (bblk * rows_per_batch) % 8 != 0:
        bblk += 1
    return bblk


# ----------------------------------------------------------------------------
# Fused kernel: conv1 + ReLU + conv2 + ReLU + flatten + output Linear
# ----------------------------------------------------------------------------
def _fused_kernel(x0_ref, x1_ref, x2_ref, x3_ref, x0s_ref,
                  w1b_ref, b1f_ref, w2b_ref, b2f_ref, wo_ref, bo_ref,
                  out_ref, h1e_ref, h1o_ref, *, m_blk):
    """One batch tile; all activations are (M, lanes) with M = bblk*(T2b+1)
    (batch and conv-output time flattened).  Per batch the last row is junk
    and is sliced off in the wrapper.

      x0..x3 : (M, I)        x row phases 4m+p (bf16)
      x0s    : (M, I)        x0 shifted down one row (odd rows' kh=2 tap)
      w1b    : (3, I, K1p)   banded conv1 weights       b1f : (1, K1p) f32
      w2b    : (3, K1p, K2p) banded conv2 weights       b2f : (1, K2p) f32
      wo     : (K2p, n_pad)  output Linear (flatten pre-permuted), bf16
      bo     : (1, n_pad) f32        out : (M, n_pad) f32
      h1e/h1o: VMEM scratch, even/odd conv1 rows (bf16); h1e has 8 halo rows.
    """
    f32 = jnp.float32

    # conv1, even h1 rows t = 2m   (x rows 4m, 4m+1, 4m+2)
    acc = jnp.dot(x0_ref[...], w1b_ref[0], preferred_element_type=f32)
    acc += jnp.dot(x1_ref[...], w1b_ref[1], preferred_element_type=f32)
    acc += jnp.dot(x2_ref[...], w1b_ref[2], preferred_element_type=f32)
    h1e_ref[:m_blk, :] = jnp.maximum(acc + b1f_ref[...], 0.0).astype(h1e_ref.dtype)
    # halo rows read by the shifted kh=2 tap at the tile boundary (junk output)
    h1e_ref[m_blk:, :] = jnp.zeros(
        (h1e_ref.shape[0] - m_blk, h1e_ref.shape[1]), h1e_ref.dtype)

    # conv1, odd h1 rows t = 2m+1  (x rows 4m+2, 4m+3, 4m+4)
    acc = jnp.dot(x2_ref[...], w1b_ref[0], preferred_element_type=f32)
    acc += jnp.dot(x3_ref[...], w1b_ref[1], preferred_element_type=f32)
    acc += jnp.dot(x0s_ref[...], w1b_ref[2], preferred_element_type=f32)
    h1o_ref[...] = jnp.maximum(acc + b1f_ref[...], 0.0).astype(h1o_ref.dtype)

    # conv2 (banded -> 3 lane-dense matmuls): h1 rows 2t2, 2t2+1, 2t2+2
    acc = jnp.dot(h1e_ref[:m_blk, :], w2b_ref[0], preferred_element_type=f32)
    acc += jnp.dot(h1o_ref[...], w2b_ref[1], preferred_element_type=f32)
    acc += jnp.dot(h1e_ref[1:m_blk + 1, :], w2b_ref[2], preferred_element_type=f32)
    h2 = jnp.maximum(acc + b2f_ref[...], 0.0).astype(wo_ref.dtype)

    # output Linear (PyTorch (b,c,t,f)->(b,t,c*f) folded into wo's permutation)
    out = jnp.dot(h2, wo_ref[...], preferred_element_type=f32) + bo_ref[...]
    out_ref[...] = out.astype(out_ref.dtype)


# ----------------------------------------------------------------------------
# One-time weight layout prep (plain XLA, weight-sized only)
# ----------------------------------------------------------------------------
def _conv1_band_weights(w1, i_dim, f2a):
    """w1 (C1,1,3,3) -> (3, I, F2a*C1): band[kh, i, f*C1+c] = w1[c,0,kh,i-2f]."""
    c1 = w1.shape[0]
    kw_rel = jnp.arange(i_dim)[:, None] - 2 * jnp.arange(f2a)[None, :]   # (I,F2a)
    valid = (kw_rel >= 0) & (kw_rel <= 2)
    kw_idx = jnp.clip(kw_rel, 0, 2)
    w1k = w1[:, 0]                                   # (C1, 3, 3) [c, kh, kw]
    band = w1k[:, :, kw_idx]                         # (C1, 3, I, F2a)
    band = jnp.where(valid[None, None], band, 0.0)
    return jnp.transpose(band, (1, 2, 3, 0)).reshape(3, i_dim, f2a * c1)


def _conv2_band_weights(w2, f2a, f2b):
    """w2 (C2,C1,3,3) -> (3, F2a*C1, F2b*C2):
    band[kh, f*C1+ci, f2*C2+co] = w2[co, ci, kh, f-2*f2] (0 outside the band)."""
    c2, c1 = w2.shape[0], w2.shape[1]
    kw_rel = jnp.arange(f2a)[:, None] - 2 * jnp.arange(f2b)[None, :]     # (F2a,F2b)
    valid = (kw_rel >= 0) & (kw_rel <= 2)
    kw_idx = jnp.clip(kw_rel, 0, 2)
    band = w2[:, :, :, kw_idx]                       # (C2, C1, 3, F2a, F2b)
    band = jnp.where(valid[None, None, None], band, 0.0)
    band = jnp.transpose(band, (2, 3, 1, 4, 0))      # (3, F2a, C1, F2b, C2)
    return band.reshape(3, f2a * c1, f2b * c2)


# ----------------------------------------------------------------------------
# Conv2DLayer forward
# ----------------------------------------------------------------------------
def conv2d_layer_forward(x, params, *, compute_dtype=jnp.bfloat16):
    """x: (B, T1, I_DIM) float32 -> (B, T2, o_dim) float32."""
    w1, b1 = params["w1"], params["b1"]
    w2, b2 = params["w2"], params["b2"]
    w_out, b_out = params["w_out"], params["b_out"]

    B, T1, I = x.shape
    C1, C2, N = w1.shape[0], w2.shape[0], w_out.shape[0]

    T2a = (T1 - 3) // 2 + 1
    F2a = (I - 3) // 2 + 1
    T2b = (T2a - 3) // 2 + 1
    F2b = (F2a - 3) // 2 + 1
    assert T2b >= 1 and F2b >= 1, "input too small for two stride-2 3x3 convs"

    K1, K2 = F2a * C1, F2b * C2
    K1p = pl.cdiv(K1, LANE) * LANE
    K2p = pl.cdiv(K2, LANE) * LANE
    n_pad = pl.cdiv(N, LANE) * LANE
    Rp = T2b + 1                      # rows per batch (last row per batch junk)

    bblk = _pick_batch_tile(B, Rp)
    nb = pl.cdiv(B, bblk)
    Btot = nb * bblk
    m_blk = bblk * Rp
    Mtot = Btot * Rp
    cdt = compute_dtype

    # --- input phase split: time stride-2 (x2 convs) = 4 row phases of x;
    #     batch + time flattened into the matmul M dimension (O(|x|), XLA) ---
    xb = x if Btot == B else jnp.pad(x, ((0, Btot - B), (0, 0), (0, 0)))
    t_need = 4 * Rp
    if T1 < t_need:
        xb = jnp.pad(xb, ((0, 0), (0, t_need - T1), (0, 0)))
    xb = xb[:, :t_need, :].astype(cdt)
    x0 = xb[:, 0::4, :].reshape(Mtot, I)
    x1 = xb[:, 1::4, :].reshape(Mtot, I)
    x2 = xb[:, 2::4, :].reshape(Mtot, I)
    x3 = xb[:, 3::4, :].reshape(Mtot, I)
    # odd conv1 rows' kh=2 tap = x0 shifted down one row (junk rows only ever
    # see the cross-batch / zero contamination and are discarded afterwards)
    x0s = jnp.concatenate([x0[1:], jnp.zeros((1, I), cdt)], axis=0)

    # --- weight layout prep (weight-sized, one-time) ---
    w1b = jnp.pad(_conv1_band_weights(w1, I, F2a),
                  ((0, 0), (0, 0), (0, K1p - K1))).astype(cdt)
    b1f = jnp.pad(jnp.tile(b1, F2a), (0, K1p - K1)).reshape(1, K1p).astype(jnp.float32)
    w2b = jnp.pad(_conv2_band_weights(w2, F2a, F2b),
                  ((0, 0), (0, K1p - K1), (0, K2p - K2))).astype(cdt)
    b2f = jnp.pad(jnp.tile(b2, F2b), (0, K2p - K2)).reshape(1, K2p).astype(jnp.float32)
    # fold PyTorch's (b,c,t,f)->(b,t,c*f) flatten into a permutation of w_out
    wo_perm = jnp.transpose(w_out.reshape(N, C2, F2b), (2, 1, 0)).reshape(K2, N)
    wo_pad = jnp.pad(wo_perm, ((0, K2p - K2), (0, n_pad - N))).astype(cdt)
    bo_pad = jnp.pad(b_out, (0, n_pad - N)).reshape(1, n_pad).astype(jnp.float32)

    itemsize = jnp.dtype(cdt).itemsize
    flops = (12 * Mtot * I * K1p            # conv1 (even + odd, 3 taps each)
             + 6 * Mtot * K1p * K2p         # conv2 (3 banded taps)
             + 2 * Mtot * K2p * n_pad)      # output Linear
    bytes_acc = (5 * Mtot * I * itemsize
                 + (3 * I * K1p + 3 * K1p * K2p + K2p * n_pad) * itemsize
                 + (K1p + K2p + n_pad) * 4
                 + Mtot * n_pad * 4)

    def _act_spec():
        return pl.BlockSpec((m_blk, I), lambda i: (i, 0))

    fused = pl.pallas_call(
        functools.partial(_fused_kernel, m_blk=m_blk),
        out_shape=jax.ShapeDtypeStruct((Mtot, n_pad), jnp.float32),
        grid=(nb,),
        in_specs=[
            _act_spec(), _act_spec(), _act_spec(), _act_spec(), _act_spec(),
            _const_spec((3, I, K1p)),
            _const_spec((1, K1p)),
            _const_spec((3, K1p, K2p)),
            _const_spec((1, K2p)),
            _const_spec((K2p, n_pad)),
            _const_spec((1, n_pad)),
        ],
        out_specs=pl.BlockSpec((m_blk, n_pad), lambda i: (i, 0)),
        scratch_shapes=[
            pltpu.VMEM((m_blk + 8, K1p), cdt),   # even h1 rows (+ halo rows)
            pltpu.VMEM((m_blk, K1p), cdt),       # odd  h1 rows
        ],
        compiler_params=pltpu.CompilerParams(
            dimension_semantics=("parallel",),
            vmem_limit_bytes=_vmem_limit_bytes()),
        cost_estimate=pl.CostEstimate(
            flops=int(flops), transcendentals=0, bytes_accessed=int(bytes_acc)),
    )
    out_flat = fused(x0, x1, x2, x3, x0s, w1b, b1f, w2b, b2f, wo_pad, bo_pad)

    # drop the per-batch junk row, padded batches and padded output lanes
    return out_flat.reshape(Btot, Rp, n_pad)[:B, :T2b, :N]


# ----------------------------------------------------------------------------
# Pure-JAX reference (mirrors PyTorch NCHW convs) for correctness checking
# ----------------------------------------------------------------------------
def reference_forward(x, params):
    w1, b1, w2, b2, w_out, b_out = (
        params["w1"], params["b1"], params["w2"], params["b2"],
        params["w_out"], params["b_out"],
    )
    x4 = x[:, None, :, :]  # NCHW, C=1
    dn = lax.conv_dimension_numbers(x4.shape, w1.shape, ("NCHW", "OIHW", "NCHW"))
    h = lax.conv_general_dilated(x4, w1, (2, 2), "VALID", dimension_numbers=dn)
    h = jax.nn.relu(h + b1[None, :, None, None])
    dn2 = lax.conv_dimension_numbers(h.shape, w2.shape, ("NCHW", "OIHW", "NCHW"))
    h = lax.conv_general_dilated(h, w2, (2, 2), "VALID", dimension_numbers=dn2)
    h = jax.nn.relu(h + b2[None, :, None, None])
    b, c, t, f = h.shape
    h = jnp.transpose(h, (0, 2, 1, 3)).reshape(b, t, c * f)
    return h @ w_out.T + b_out


# ----------------------------------------------------------------------------
# Deterministic parameter init
# ----------------------------------------------------------------------------
def init_params(key, i_dim, o_dim):
    k = jax.random.split(key, 6)
    f_dim = (i_dim - 3) // 2 + 1
    f_dim = (f_dim - 3) // 2 + 1
    return {
        "w1": 0.1 * jax.random.normal(k[0], (o_dim, 1, 3, 3), jnp.float32),
        "b1": 0.1 * jax.random.normal(k[1], (o_dim,), jnp.float32),
        "w2": 0.05 * jax.random.normal(k[2], (o_dim, o_dim, 3, 3), jnp.float32),
        "b2": 0.1 * jax.random.normal(k[3], (o_dim,), jnp.float32),
        "w_out": 0.05 * jax.random.normal(k[4], (o_dim, o_dim * f_dim), jnp.float32),
        "b_out": 0.1 * jax.random.normal(k[5], (o_dim,), jnp.float32),
    }


if __name__ == "__main__":
    B, T1, I_DIM, O_DIM = 2, 16, 16, 32

    key = jax.random.PRNGKey(0)
    kx, kp = jax.random.split(key)
    x = jax.random.normal(kx, (B, T1, I_DIM), jnp.float32)
    params = init_params(kp, I_DIM, O_DIM)

    out = jax.block_until_ready(conv2d_layer_forward(x, params))
    ref = jax.block_until_ready(reference_forward(x, params))

    assert out.shape == ref.shape, (out.shape, ref.shape)
    # bf16 matmul operands with f32 accumulation -> looser tolerance than f32.
    max_err = float(jnp.max(jnp.abs(out - ref)))
    assert jnp.allclose(out, ref, atol=3e-2, rtol=3e-2), max_err
    print("KERNEL_OK")
</pallas_src>

<mosaic_0001>
module attributes {stable_mosaic.version = 11 : i64} {
  func.func @_fused_kernel(%arg0: i32, %arg1: memref<8x16xbf16, #tpu.memory_space<vmem>>, %arg2: memref<8x16xbf16, #tpu.memory_space<vmem>>, %arg3: memref<8x16xbf16, #tpu.memory_space<vmem>>, %arg4: memref<8x16xbf16, #tpu.memory_space<vmem>>, %arg5: memref<8x16xbf16, #tpu.memory_space<vmem>>, %arg6: memref<3x16x256xbf16, #tpu.memory_space<vmem>>, %arg7: memref<1x256xf32, #tpu.memory_space<vmem>>, %arg8: memref<3x256x128xbf16, #tpu.memory_space<vmem>>, %arg9: memref<1x128xf32, #tpu.memory_space<vmem>>, %arg10: memref<128x128xbf16, #tpu.memory_space<vmem>>, %arg11: memref<1x128xf32, #tpu.memory_space<vmem>>, %arg12: memref<8x128xf32, #tpu.memory_space<vmem>>, %arg13: memref<16x256xbf16, #tpu.memory_space<vmem>>, %arg14: memref<8x256xbf16, #tpu.memory_space<vmem>>) attributes {dimension_semantics = [#tpu.dimension_semantics<parallel>], iteration_bounds = array<i64: 1>, scalar_prefetch = 0 : i64, scratch_operands = 2 : i64, tpu.core_type = #tpu.core_type<tc>, window_params = [{transform_indices = @transform_0, window_bounds = array<i64: 8, 16>}, {transform_indices = @transform_1, window_bounds = array<i64: 8, 16>}, {transform_indices = @transform_2, window_bounds = array<i64: 8, 16>}, {transform_indices = @transform_3, window_bounds = array<i64: 8, 16>}, {transform_indices = @transform_4, window_bounds = array<i64: 8, 16>}, {pipeline_mode = #tpu.pipeline_mode<synchronous>, transform_indices = @transform_5, window_bounds = array<i64: 3, 16, 256>}, {pipeline_mode = #tpu.pipeline_mode<synchronous>, transform_indices = @transform_6, window_bounds = array<i64: 1, 256>}, {pipeline_mode = #tpu.pipeline_mode<synchronous>, transform_indices = @transform_7, window_bounds = array<i64: 3, 256, 128>}, {pipeline_mode = #tpu.pipeline_mode<synchronous>, transform_indices = @transform_8, window_bounds = array<i64: 1, 128>}, {pipeline_mode = #tpu.pipeline_mode<synchronous>, transform_indices = @transform_9, window_bounds = array<i64: 128, 128>}, {pipeline_mode = #tpu.pipeline_mode<synchronous>, transform_indices = @transform_10, window_bounds = array<i64: 1, 128>}, {transform_indices = @transform_11, window_bounds = array<i64: 8, 128>}]} {
    %c0 = arith.constant 0 : index
    %c0_0 = arith.constant 0 : index
    %0 = vector.load %arg1[%c0, %c0_0] : memref<8x16xbf16, #tpu.memory_space<vmem>>, vector<8x16xbf16>
    %c0_1 = arith.constant 0 : index
    %c0_2 = arith.constant 0 : index
    %c0_3 = arith.constant 0 : index
    %1 = vector.load %arg6[%c0_1, %c0_2, %c0_3] : memref<3x16x256xbf16, #tpu.memory_space<vmem>>, vector<1x16x256xbf16>
    %2 = vector.shape_cast %1 : vector<1x16x256xbf16> to vector<16x256xbf16>
    %cst = arith.constant dense<0.000000e+00> : vector<8x256xf32>
    %3 = tpu.matmul %0, %2, %cst {dimension_numbers = #tpu.dot_dimension_numbers<[1], [0], [0], [1], [0, 0, 1, 1], [], []>} : vector<8x16xbf16>, vector<16x256xbf16>, vector<8x256xf32> -> vector<8x256xf32>
    %c0_4 = arith.constant 0 : index
    %c0_5 = arith.constant 0 : index
    %4 = vector.load %arg2[%c0_4, %c0_5] : memref<8x16xbf16, #tpu.memory_space<vmem>>, vector<8x16xbf16>
    %c1 = arith.constant 1 : index
    %c0_6 = arith.constant 0 : index
    %c0_7 = arith.constant 0 : index
    %5 = vector.load %arg6[%c1, %c0_6, %c0_7] : memref<3x16x256xbf16, #tpu.memory_space<vmem>>, vector<1x16x256xbf16>
    %6 = vector.shape_cast %5 : vector<1x16x256xbf16> to vector<16x256xbf16>
    %cst_8 = arith.constant dense<0.000000e+00> : vector<8x256xf32>
    %7 = tpu.matmul %4, %6, %cst_8 {dimension_numbers = #tpu.dot_dimension_numbers<[1], [0], [0], [1], [0, 0, 1, 1], [], []>} : vector<8x16xbf16>, vector<16x256xbf16>, vector<8x256xf32> -> vector<8x256xf32>
    %8 = arith.addf %3, %7 : vector<8x256xf32>
    %c0_9 = arith.constant 0 : index
    %c0_10 = arith.constant 0 : index
    %9 = vector.load %arg3[%c0_9, %c0_10] : memref<8x16xbf16, #tpu.memory_space<vmem>>, vector<8x16xbf16>
    %c2 = arith.constant 2 : index
    %c0_11 = arith.constant 0 : index
    %c0_12 = arith.constant 0 : index
    %10 = vector.load %arg6[%c2, %c0_11, %c0_12] : memref<3x16x256xbf16, #tpu.memory_space<vmem>>, vector<1x16x256xbf16>
    %11 = vector.shape_cast %10 : vector<1x16x256xbf16> to vector<16x256xbf16>
    %cst_13 = arith.constant dense<0.000000e+00> : vector<8x256xf32>
    %12 = tpu.matmul %9, %11, %cst_13 {dimension_numbers = #tpu.dot_dimension_numbers<[1], [0], [0], [1], [0, 0, 1, 1], [], []>} : vector<8x16xbf16>, vector<16x256xbf16>, vector<8x256xf32> -> vector<8x256xf32>
    %13 = arith.addf %8, %12 : vector<8x256xf32>
    %c0_14 = arith.constant 0 : index
    %c0_15 = arith.constant 0 : index
    %14 = vector.load %arg7[%c0_14, %c0_15] : memref<1x256xf32, #tpu.memory_space<vmem>>, vector<1x256xf32>
    %15 = vector.broadcast %14 : vector<1x256xf32> to vector<8x256xf32>
    %16 = arith.addf %13, %15 : vector<8x256xf32>
    %cst_16 = arith.constant 0.000000e+00 : f32
    %17 = vector.broadcast %cst_16 : f32 to vector<8x256xf32>
    %18 = arith.maximumf %16, %17 : vector<8x256xf32>
    %19 = arith.truncf %18 : vector<8x256xf32> to vector<8x256xbf16>
    %c0_17 = arith.constant 0 : index
    %c0_18 = arith.constant 0 : index
    %20 = vector.load %arg13[%c0_17, %c0_18] : memref<16x256xbf16, #tpu.memory_space<vmem>>, vector<8x256xbf16>
    tpu.vector_store %arg13[%c0_17, %c0_18], %19 {strides = array<i32>} : memref<16x256xbf16, #tpu.memory_space<vmem>>, vector<8x256xbf16>,
    %cst_19 = arith.constant 0.000000e+00 : bf16
    %21 = vector.broadcast %cst_19 : bf16 to vector<8x256xbf16>
    %c8 = arith.constant 8 : index
    %c0_20 = arith.constant 0 : index
    %22 = vector.load %arg13[%c8, %c0_20] : memref<16x256xbf16, #tpu.memory_space<vmem>>, vector<8x256xbf16>
    tpu.vector_store %arg13[%c8, %c0_20], %21 {strides = array<i32>} : memref<16x256xbf16, #tpu.memory_space<vmem>>, vector<8x256xbf16>,
    %c0_21 = arith.constant 0 : index
    %c0_22 = arith.constant 0 : index
    %23 = vector.load %arg3[%c0_21, %c0_22] : memref<8x16xbf16, #tpu.memory_space<vmem>>, vector<8x16xbf16>
    %c0_23 = arith.constant 0 : index
    %c0_24 = arith.constant 0 : index
    %c0_25 = arith.constant 0 : index
    %24 = vector.load %arg6[%c0_23, %c0_24, %c0_25] : memref<3x16x256xbf16, #tpu.memory_space<vmem>>, vector<1x16x256xbf16>
    %25 = vector.shape_cast %24 : vector<1x16x256xbf16> to vector<16x256xbf16>
    %cst_26 = arith.constant dense<0.000000e+00> : vector<8x256xf32>
    %26 = tpu.matmul %23, %25, %cst_26 {dimension_numbers = #tpu.dot_dimension_numbers<[1], [0], [0], [1], [0, 0, 1, 1], [], []>} : vector<8x16xbf16>, vector<16x256xbf16>, vector<8x256xf32> -> vector<8x256xf32>
    %c0_27 = arith.constant 0 : index
    %c0_28 = arith.constant 0 : index
    %27 = vector.load %arg4[%c0_27, %c0_28] : memref<8x16xbf16, #tpu.memory_space<vmem>>, vector<8x16xbf16>
    %c1_29 = arith.constant 1 : index
    %c0_30 = arith.constant 0 : index
    %c0_31 = arith.constant 0 : index
    %28 = vector.load %arg6[%c1_29, %c0_30, %c0_31] : memref<3x16x256xbf16, #tpu.memory_space<vmem>>, vector<1x16x256xbf16>
    %29 = vector.shape_cast %28 : vector<1x16x256xbf16> to vector<16x256xbf16>
    %cst_32 = arith.constant dense<0.000000e+00> : vector<8x256xf32>
    %30 = tpu.matmul %27, %29, %cst_32 {dimension_numbers = #tpu.dot_dimension_numbers<[1], [0], [0], [1], [0, 0, 1, 1], [], []>} : vector<8x16xbf16>, vector<16x256xbf16>, vector<8x256xf32> -> vector<8x256xf32>
    %31 = arith.addf %26, %30 : vector<8x256xf32>
    %c0_33 = arith.constant 0 : index
    %c0_34 = arith.constant 0 : index
    %32 = vector.load %arg5[%c0_33, %c0_34] : memref<8x16xbf16, #tpu.memory_space<vmem>>, vector<8x16xbf16>
    %c2_35 = arith.constant 2 : index
    %c0_36 = arith.constant 0 : index
    %c0_37 = arith.constant 0 : index
    %33 = vector.load %arg6[%c2_35, %c0_36, %c0_37] : memref<3x16x256xbf16, #tpu.memory_space<vmem>>, vector<1x16x256xbf16>
    %34 = vector.shape_cast %33 : vector<1x16x256xbf16> to vector<16x256xbf16>
    %cst_38 = arith.constant dense<0.000000e+00> : vector<8x256xf32>
    %35 = tpu.matmul %32, %34, %cst_38 {dimension_numbers = #tpu.dot_dimension_numbers<[1], [0], [0], [1], [0, 0, 1, 1], [], []>} : vector<8x16xbf16>, vector<16x256xbf16>, vector<8x256xf32> -> vector<8x256xf32>
    %36 = arith.addf %31, %35 : vector<8x256xf32>
    %c0_39 = arith.constant 0 : index
    %c0_40 = arith.constant 0 : index
    %37 = vector.load %arg7[%c0_39, %c0_40] : memref<1x256xf32, #tpu.memory_space<vmem>>, vector<1x256xf32>
    %38 = vector.broadcast %37 : vector<1x256xf32> to vector<8x256xf32>
    %39 = arith.addf %36, %38 : vector<8x256xf32>
    %cst_41 = arith.constant 0.000000e+00 : f32
    %40 = vector.broadcast %cst_41 : f32 to vector<8x256xf32>
    %41 = arith.maximumf %39, %40 : vector<8x256xf32>
    %42 = arith.truncf %41 : vector<8x256xf32> to vector<8x256xbf16>
    %c0_42 = arith.constant 0 : index
    %c0_43 = arith.constant 0 : index
    %43 = vector.load %arg14[%c0_42, %c0_43] : memref<8x256xbf16, #tpu.memory_space<vmem>>, vector<8x256xbf16>
    tpu.vector_store %arg14[%c0_42, %c0_43], %42 {strides = array<i32>} : memref<8x256xbf16, #tpu.memory_space<vmem>>, vector<8x256xbf16>,
    %c0_44 = arith.constant 0 : index
    %c0_45 = arith.constant 0 : index
    %44 = vector.load %arg13[%c0_44, %c0_45] : memref<16x256xbf16, #tpu.memory_space<vmem>>, vector<8x256xbf16>
    %c0_46 = arith.constant 0 : index
    %c0_47 = arith.constant 0 : index
    %c0_48 = arith.constant 0 : index
    %45 = vector.load %arg8[%c0_46, %c0_47, %c0_48] : memref<3x256x128xbf16, #tpu.memory_space<vmem>>, vector<1x256x128xbf16>
    %46 = vector.shape_cast %45 : vector<1x256x128xbf16> to vector<256x128xbf16>
    %cst_49 = arith.constant dense<0.000000e+00> : vector<8x128xf32>
    %47 = tpu.matmul %44, %46, %cst_49 {dimension_numbers = #tpu.dot_dimension_numbers<[1], [0], [0], [1], [0, 0, 1, 1], [], []>} : vector<8x256xbf16>, vector<256x128xbf16>, vector<8x128xf32> -> vector<8x128xf32>
    %c0_50 = arith.constant 0 : index
    %c0_51 = arith.constant 0 : index
    %48 = vector.load %arg14[%c0_50, %c0_51] : memref<8x256xbf16, #tpu.memory_space<vmem>>, vector<8x256xbf16>
    %c1_52 = arith.constant 1 : index
    %c0_53 = arith.constant 0 : index
    %c0_54 = arith.constant 0 : index
    %49 = vector.load %arg8[%c1_52, %c0_53, %c0_54] : memref<3x256x128xbf16, #tpu.memory_space<vmem>>, vector<1x256x128xbf16>
    %50 = vector.shape_cast %49 : vector<1x256x128xbf16> to vector<256x128xbf16>
    %cst_55 = arith.constant dense<0.000000e+00> : vector<8x128xf32>
    %51 = tpu.matmul %48, %50, %cst_55 {dimension_numbers = #tpu.dot_dimension_numbers<[1], [0], [0], [1], [0, 0, 1, 1], [], []>} : vector<8x256xbf16>, vector<256x128xbf16>, vector<8x128xf32> -> vector<8x128xf32>
    %52 = arith.addf %47, %51 : vector<8x128xf32>
    %c1_56 = arith.constant 1 : index
    %c0_57 = arith.constant 0 : index
    %53 = vector.load %arg13[%c1_56, %c0_57] : memref<16x256xbf16, #tpu.memory_space<vmem>>, vector<8x256xbf16>
    %c2_58 = arith.constant 2 : index
    %c0_59 = arith.constant 0 : index
    %c0_60 = arith.constant 0 : index
    %54 = vector.load %arg8[%c2_58, %c0_59, %c0_60] : memref<3x256x128xbf16, #tpu.memory_space<vmem>>, vector<1x256x128xbf16>
    %55 = vector.shape_cast %54 : vector<1x256x128xbf16> to vector<256x128xbf16>
    %cst_61 = arith.constant dense<0.000000e+00> : vector<8x128xf32>
    %56 = tpu.matmul %53, %55, %cst_61 {dimension_numbers = #tpu.dot_dimension_numbers<[1], [0], [0], [1], [0, 0, 1, 1], [], []>} : vector<8x256xbf16>, vector<256x128xbf16>, vector<8x128xf32> -> vector<8x128xf32>
    %57 = arith.addf %52, %56 : vector<8x128xf32>
    %c0_62 = arith.constant 0 : index
    %c0_63 = arith.constant 0 : index
    %58 = vector.load %arg9[%c0_62, %c0_63] : memref<1x128xf32, #tpu.memory_space<vmem>>, vector<1x128xf32>
    %59 = vector.broadcast %58 : vector<1x128xf32> to vector<8x128xf32>
    %60 = arith.addf %57, %59 : vector<8x128xf32>
    %cst_64 = arith.constant 0.000000e+00 : f32
    %61 = vector.broadcast %cst_64 : f32 to vector<8x128xf32>
    %62 = arith.maximumf %60, %61 : vector<8x128xf32>
    %63 = arith.truncf %62 : vector<8x128xf32> to vector<8x128xbf16>
    %c0_65 = arith.constant 0 : index
    %c0_66 = arith.constant 0 : index
    %64 = vector.load %arg10[%c0_65, %c0_66] : memref<128x128xbf16, #tpu.memory_space<vmem>>, vector<128x128xbf16>
    %cst_67 = arith.constant dense<0.000000e+00> : vector<8x128xf32>
    %65 = tpu.matmul %63, %64, %cst_67 {dimension_numbers = #tpu.dot_dimension_numbers<[1], [0], [0], [1], [0, 0, 1, 1], [], []>} : vector<8x128xbf16>, vector<128x128xbf16>, vector<8x128xf32> -> vector<8x128xf32>
    %c0_68 = arith.constant 0 : index
    %c0_69 = arith.constant 0 : index
    %66 = vector.load %arg11[%c0_68, %c0_69] : memref<1x128xf32, #tpu.memory_space<vmem>>, vector<1x128xf32>
    %67 = vector.broadcast %66 : vector<1x128xf32> to vector<8x128xf32>
    %68 = arith.addf %65, %67 : vector<8x128xf32>
    %c0_70 = arith.constant 0 : index
    %c0_71 = arith.constant 0 : index
    %69 = vector.load %arg12[%c0_70, %c0_71] : memref<8x128xf32, #tpu.memory_space<vmem>>, vector<8x128xf32>
    tpu.vector_store %arg12[%c0_70, %c0_71], %68 {strides = array<i32>} : memref<8x128xf32, #tpu.memory_space<vmem>>, vector<8x128xf32>,
    return
  }
  func.func @transform_0(%arg0: i32) -> (i32, i32) {
    %c0_i32 = arith.constant 0 : i32
    %c0_i32_0 = arith.constant 0 : i32
    return %arg0, %c0_i32 : i32, i32
  }
  func.func @transform_1(%arg0: i32) -> (i32, i32) {
    %c0_i32 = arith.constant 0 : i32
    %c0_i32_0 = arith.constant 0 : i32
    return %arg0, %c0_i32 : i32, i32
  }
  func.func @transform_2(%arg0: i32) -> (i32, i32) {
    %c0_i32 = arith.constant 0 : i32
    %c0_i32_0 = arith.constant 0 : i32
    return %arg0, %c0_i32 : i32, i32
  }
  func.func @transform_3(%arg0: i32) -> (i32, i32) {
    %c0_i32 = arith.constant 0 : i32
    %c0_i32_0 = arith.constant 0 : i32
    return %arg0, %c0_i32 : i32, i32
  }
  func.func @transform_4(%arg0: i32) -> (i32, i32) {
    %c0_i32 = arith.constant 0 : i32
    %c0_i32_0 = arith.constant 0 : i32
    return %arg0, %c0_i32 : i32, i32
  }
  func.func @transform_5(%arg0: i32) -> (i32, i32, i32) {
    %c0_i32 = arith.constant 0 : i32
    %c0_i32_0 = arith.constant 0 : i32
    %c0_i32_1 = arith.constant 0 : i32
    %c0_i32_2 = arith.constant 0 : i32
    return %c0_i32, %c0_i32_0, %c0_i32_1 : i32, i32, i32
  }
  func.func @transform_6(%arg0: i32) -> (i32, i32) {
    %c0_i32 = arith.constant 0 : i32
    %c0_i32_0 = arith.constant 0 : i32
    %c0_i32_1 = arith.constant 0 : i32
    return %c0_i32, %c0_i32_0 : i32, i32
  }
  func.func @transform_7(%arg0: i32) -> (i32, i32, i32) {
    %c0_i32 = arith.constant 0 : i32
    %c0_i32_0 = arith.constant 0 : i32
    %c0_i32_1 = arith.constant 0 : i32
    %c0_i32_2 = arith.constant 0 : i32
    return %c0_i32, %c0_i32_0, %c0_i32_1 : i32, i32, i32
  }
  func.func @transform_8(%arg0: i32) -> (i32, i32) {
    %c0_i32 = arith.constant 0 : i32
    %c0_i32_0 = arith.constant 0 : i32
    %c0_i32_1 = arith.constant 0 : i32
    return %c0_i32, %c0_i32_0 : i32, i32
  }
  func.func @transform_9(%arg0: i32) -> (i32, i32) {
    %c0_i32 = arith.constant 0 : i32
    %c0_i32_0 = arith.constant 0 : i32
    %c0_i32_1 = arith.constant 0 : i32
    return %c0_i32, %c0_i32_0 : i32, i32
  }
  func.func @transform_10(%arg0: i32) -> (i32, i32) {
    %c0_i32 = arith.constant 0 : i32
    %c0_i32_0 = arith.constant 0 : i32
    %c0_i32_1 = arith.constant 0 : i32
    return %c0_i32, %c0_i32_0 : i32, i32
  }
  func.func @transform_11(%arg0: i32) -> (i32, i32) {
    %c0_i32 = arith.constant 0 : i32
    %c0_i32_0 = arith.constant 0 : i32
    return %arg0, %c0_i32 : i32, i32
  }
}

</mosaic_0001>

<bundles_post_ra>
// kernel: tpu_custom_call.1
= control target key start
LH: loop header
LB: loop body
LE: loop exit
PB: predicated region body
PF: predicated region fallthrough
CT: control target
= control target key end

     0   :  { %16 = vsyncpa [#allocation5], 0  ;;  %s1777_s0 = inlined_call_operand.hbm [shape: bf16[8,16], index: 0, kind: input, shape index: {}]   ;;  %s1778_s1 = inlined_call_operand.hbm [shape: bf16[8,16], index: 1, kind: input, shape index: {}]   ;;  %s1779_s2 = inlined_call_operand.hbm [shape: bf16[8,16], index: 2, kind: input, shape index: {}]   ;;  %s1780_s3 = inlined_call_operand.vmem [shape: bf16[8,16], index: 3, kind: input, shape index: {}]   ;;  %s1781_s4 = inlined_call_operand.hbm [shape: bf16[8,16], index: 4, kind: input, shape index: {}]   ;;  %s1782_s5 = inlined_call_operand.hbm [shape: bf16[3,16,256], index: 5, kind: input, shape index: {}]   ;;  %s1783_s6 = inlined_call_operand.vmem [shape: f32[1,256], index: 6, kind: input, shape index: {}]   ;;  %s1784_s7 = inlined_call_operand.hbm [shape: bf16[3,256,128], index: 7, kind: input, shape index: {}]   ;;  %s1785_s8 = inlined_call_operand.vmem [shape: f32[1,128], index: 8, kind: input, shape index: {}]   ;;  %s1786_s9 = inlined_call_operand.hbm [shape: bf16[128,128], index: 9, kind: input, shape index: {}]   ;;  %s1787_s10 = inlined_call_operand.vmem [shape: f32[1,128], index: 10, kind: input, shape index: {}]   ;;  %s1788_s11 = inlined_call_operand.hbm [shape: f32[8,128], index: 11, kind: output, shape index: {}]  }
   0x1   :  { %17 = vsyncpa [#allocation8], 0 }
   0x2   :  { %18 = vsyncpa [#allocation11], 0 }
   0x3   :  { %19 = vsyncpa [#allocation14], 0 }
   0x4   :  { %20 = vsyncpa [#allocation6], 0  ;;  %s1651_s17 = smov [#allocation7]   ;;  %s1652_s19 = smov [#allocation10]  }
   0x5   :  { %s37_s18 = sshll.u32 %s1651_s17, 4  ;;  %s59_s20 = sshll.u32 %s1652_s19, 4  ;;  %s38_s18 = int_to_ptr.vmem [resolvable:$true] %s37_s18  ;;  %s60_s20 = int_to_ptr.vmem [resolvable:$true] %s59_s20 }
   0x6   :  { %s1489_s21 = scalar_lea.vmem %s38_s18, 64  ;;  %p1494_p1 = scmp.lt.s32.totalorder %s38_s18, %s38_s18 }
   0x7   :  { %p1490_p0 = scmp.ne.s32.totalorder %s38_s18, %s1489_s21  ;;  %p1495_p2 = scmp.lt.s32.totalorder %s1489_s21, %s1489_s21 }
   0x9   :  { %p1496_p3 = por %p1495_p2, %p1494_p1 }
   0xb   :  { %p1497_p4 = pnand %p1496_p3, %p1490_p0 }
   0xd   :  { %1500 = shalt.err (!%p1497_p4)
}
   0xe   :  { %40 = dma.hbm_to_vmem [thread:$0]  %s1778_s1, 64, %s38_s18, [#allocation8]  }
   0xf   :  { %s1509_s24 = scalar_lea.vmem %s60_s20, 64  ;;  %p1514_p6 = scmp.lt.s32.totalorder %s60_s20, %s60_s20 }
  0x10   :  { %p1510_p5 = scmp.ne.s32.totalorder %s60_s20, %s1509_s24  ;;  %p1515_p7 = scmp.lt.s32.totalorder %s1509_s24, %s1509_s24 }
  0x12   :  { %p1516_p8 = por %p1515_p7, %p1514_p6 }
  0x14   :  { %p1517_p9 = pnand %p1516_p8, %p1510_p5 }
  0x16   :  { %1520 = shalt.err (!%p1517_p9)
}
  0x17   :  { %62 = dma.hbm_to_vmem [thread:$0]  %s1781_s4, 64, %s60_s20, [#allocation11]  }
  0x18   :  { %s1653_s27 = smov [#allocation13]  }
  0x19   :  { %s82_s28 = sshll.u32 %s1653_s27, 4  ;;  %s83_s28 = int_to_ptr.vmem [resolvable:$true] %s82_s28 }
  0x1a   :  { %s1529_s29 = scalar_lea.vmem %s83_s28, 6144  ;;  %p1534_p11 = scmp.lt.s32.totalorder %s83_s28, %s83_s28 }
  0x1b   :  { %p1530_p10 = scmp.ne.s32.totalorder %s83_s28, %s1529_s29  ;;  %p1535_p12 = scmp.lt.s32.totalorder %s1529_s29, %s1529_s29 }
  0x1d   :  { %p1536_p13 = por %p1535_p12, %p1534_p11 }
  0x1f   :  { %p1537_p0 = pnand %p1536_p13, %p1530_p10 }
  0x21   :  { %1540 = shalt.err (!%p1537_p0)
}
  0x22   :  { %s1654_s1 = smov 64   ;;  %s1655_s30 = smov 4  }
  0x23   :  { %88 = dma.hbm_to_vmem [thread:$0]  %s1784_s7, 6144, %s83_s28, [#allocation14], %s1654_s1, %s1654_s1, %s1655_s30  }
  0x24   :  { %s1656_s4 = smov [#allocation4]   ;;  %s1657_s15 = smov [#allocation9]  }
  0x25   :  { %s27_s14 = sshll.u32 %s1656_s4, 4  ;;  %s47_s16 = sshll.u32 %s1657_s15, 4  ;;  %s28_s14 = int_to_ptr.vmem [resolvable:$true] %s27_s14  ;;  %s48_s16 = int_to_ptr.vmem [resolvable:$true] %s47_s16 }
  0x26   :  { %s1549_s17 = scalar_lea.vmem %s28_s14, 64  ;;  %p1554_p2 = scmp.lt.s32.totalorder %s28_s14, %s28_s14 }
  0x27   :  { %p1550_p1 = scmp.ne.s32.totalorder %s28_s14, %s1549_s17  ;;  %p1555_p3 = scmp.lt.s32.totalorder %s1549_s17, %s1549_s17 }
  0x29   :  { %p1556_p4 = por %p1555_p3, %p1554_p2 }
  0x2b   :  { %p1557_p5 = pnand %p1556_p4, %p1550_p1 }
  0x2d   :  { %1560 = shalt.err (!%p1557_p5)
}
  0x2e   :  { %30 = dma.hbm_to_vmem [thread:$0]  %s1777_s0, 64, %s28_s14, [#allocation5]  }
  0x2f   :  { %s1569_s20 = scalar_lea.vmem %s48_s16, 64  ;;  %p1574_p7 = scmp.lt.s32.totalorder %s48_s16, %s48_s16 }
  0x30   :  { %p1570_p6 = scmp.ne.s32.totalorder %s48_s16, %s1569_s20  ;;  %p1575_p8 = scmp.lt.s32.totalorder %s1569_s20, %s1569_s20 }
  0x32   :  { %p1576_p9 = por %p1575_p8, %p1574_p7 }
  0x34   :  { %p1577_p10 = pnand %p1576_p9, %p1570_p6 }
  0x36   :  { %1580 = shalt.err (!%p1577_p10)
}
  0x37   :  { %50 = dma.hbm_to_vmem [thread:$0]  %s1779_s2, 64, %s48_s16, [#allocation8]  }
  0x38   :  { %s1658_s22 = smov [#allocation12]  }
  0x39   :  { %s68_s23 = sshll.u32 %s1658_s22, 4  ;;  %s69_s23 = int_to_ptr.vmem [resolvable:$true] %s68_s23 }
  0x3a   :  { %s1589_s24 = scalar_lea.vmem %s69_s23, 768  ;;  %p1594_p12 = scmp.lt.s32.totalorder %s69_s23, %s69_s23 }
  0x3b   :  { %p1590_p11 = scmp.ne.s32.totalorder %s69_s23, %s1589_s24  ;;  %p1595_p13 = scmp.lt.s32.totalorder %s1589_s24, %s1589_s24 }
  0x3d   :  { %p1596_p0 = por %p1595_p13, %p1594_p12 }
  0x3f   :  { %p1597_p1 = pnand %p1596_p0, %p1590_p11 }
  0x41   :  { %1600 = shalt.err (!%p1597_p1)
}
  0x42   :  { %s1659_s0 = smov 128   ;;  %s1660_s25 = smov 8  }
  0x43   :  { %74 = dma.hbm_to_vmem [thread:$0]  %s1782_s5, 768, %s69_s23, [#allocation11], %s1659_s0, %s1659_s0, %s1660_s25  }
  0x44   :  { %s1661_s28 = smov [#allocation15]  }
  0x45   :  { %s96_s29 = sshll.u32 %s1661_s28, 4  ;;  %s97_s29 = int_to_ptr.vmem [resolvable:$true] %s96_s29 }
  0x46   :  { %s1609_s2 = scalar_lea.vmem %s97_s29, 1024  ;;  %p1614_p3 = scmp.lt.s32.totalorder %s97_s29, %s97_s29 }
  0x47   :  { %p1610_p2 = scmp.ne.s32.totalorder %s97_s29, %s1609_s2  ;;  %p1615_p4 = scmp.lt.s32.totalorder %s1609_s2, %s1609_s2 }
  0x49   :  { %p1616_p5 = por %p1615_p4, %p1614_p3 }
  0x4b   :  { %p1617_p6 = pnand %p1616_p5, %p1610_p2 }
  0x4d   :  { %1620 = shalt.err (!%p1617_p6)
}
  0x4e   :  { %102 = dma.hbm_to_vmem [thread:$0]  %s1786_s9, 1024, %s97_s29, [#allocation14], %s1654_s1, %s1654_s1, %s1655_s30  }
  0x4f   :  { %1641 = dma.done.wait [#allocation5], 64  }
  0x50   :  { %1642 = vsyncadd [#allocation5], 4294967232 }
  0x51   :  { %1643 = dma.done.wait [#allocation8], 128  }
  0x52   :  { %1644 = vsyncadd [#allocation8], 4294967168 }
  0x53   :  { %1645 = dma.done.wait [#allocation11], 832  }
  0x54   :  { %1646 = vsyncadd [#allocation11], 4294966464 }
  0x55   :  { %1647 = dma.done.wait [#allocation14], 7168  }
  0x56   :  { %1648 = vsyncadd [#allocation14], 4294960128  ;;  %v1662_v0 = vmov 0   ;;  %v1414_v1 = vld [vmem:[#allocation12 + $0x14] ss:$8 sps:$4 sm:$0xff]   ;;  %vm144_vm0 = vcmask 130048   ;;  %v305_v46 = vlaneseq }
  0x57   :  { %180 = vmatprep.mubr.bf16.mxu0 %v1662_v0  ;;  %328 = vst [vmem:[#allocation2 + $0x8] sm:$0xff] %v1662_v0  ;;  %234 = vmatprep.mubr.bf16.mxu1 %v1662_v0  ;;  %v1416_v2 = vld [vmem:[#allocation12 + $0x4] ss:$8 sps:$4 sm:$0xff]   ;;  %v1418_v3 = vld [vmem:[#allocation12 + $0x10] ss:$8 sps:$4 sm:$0xff]   ;;  %vm1664_vm1 = vmmov 0  }
  0x58   :  { %162 = vmatprep.subr.bf16.mxu0 %v1414_v1  ;;  %v1419_v4 = vld [vmem:[#allocation12] ss:$8 sps:$4 sm:$0xff]   ;;  %216 = vmatprep.subr.bf16.mxu1 %v1416_v2  ;;  %v130_v5 = vld [vmem:[#allocation7] sm:$0xf]  ;;  %v127_v6 = vld [vmem:[#allocation4] sm:$0xf] }
  0x59   :  { %163 = vmatpush1.bf16.msra.mxu0 %v1418_v3  ;;  %217 = vmatpush1.bf16.msra.mxu1 %v1419_v4  ;;  %v1420_v7 = vld [vmem:[#allocation12 + $0x20] ss:$8 sps:$4 sm:$0xff]   ;;  %v1422_v8 = vld [vmem:[#allocation12 + $0x24] ss:$8 sps:$4 sm:$0xff]   ;;  %v243_v9 = vld [vmem:[#allocation9] sm:$0xf] }
  0x5a   :  { %362 = vmatprep.subr.bf16.mxu1 %v1414_v1  ;;  %274 = vmatprep.subr.bf16.mxu0 %v1422_v8  ;;  %v332_v10 = vld [vmem:[%s1780_s3] sm:$0xf]  ;;  %v1423_v11 = vld [vmem:[#allocation13 + $0xf8] sm:$0xff]   ;;  %v329_v13 = vld [vmem:[#allocation9] sm:$0xf]  ;;  %v306_v47 = vshrl.u32 %v305_v46, 7 }
  0x5b   :  { %v1425_v12 = vld [vmem:[#allocation13 + $0x78] sm:$0xff]   ;;  %v443_v14 = vld [vmem:[#allocation10] sm:$0xf]  ;;  %v1429_v17 = vld [vmem:[#allocation13 + $0x70] sm:$0xff]   ;;  %s1665_s17 = smov [#allocation16]  }
  0x5c   :  { %1218 = vmatmul.mubr.msk.bf16.vlgmr.msra.gmra.mxu0 %vm144_vm0, %v130_v5  ;;  %1221 = vmatmul.mubr.msk.bf16.vlgmr.msra.gmra.mxu1 %vm144_vm0, %v127_v6  ;;  %v1424_v15 = vld [vmem:[#allocation13 + $0xb8] sm:$0xff]   ;;  %v1430_v18 = vld [vmem:[#allocation13 + $0x30] sm:$0xff]   ;;  %v1433_v19 = vld [vmem:[#allocation13 + $0x68] sm:$0xff]   ;;  %v307_v52 = vsub.s32 0, %v306_v47  ;;  %v311_v56 = vsub.s32 1, %v306_v47  ;;  %s1204_s18 = sshll.u32 %s1665_s17, 4  ;;  %s1205_s18 = int_to_ptr.vmem [resolvable:$true] %s1204_s18 }
  0x5d   :  { %275 = vmatpush1.bf16.msra.mxu0 %v1420_v7  ;;  %363 = vmatpush1.bf16.msra.mxu1 %v1418_v3  ;;  %v1426_v16 = vld [vmem:[#allocation13 + $0x38] sm:$0xff]   ;;  %v1434_v20 = vld [vmem:[#allocation13 + $0x28] sm:$0xff]   ;;  %v1427_v21 = vld [vmem:[#allocation13 + $0xf0] sm:$0xff]   ;;  %p1626_p8 = scmp.lt.s32.totalorder %s1205_s18, %s1205_s18 }
  0x5e   :  { %292 = vmatprep.mubr.bf16.mxu0 %v1662_v0  ;;  %380 = vmatprep.mubr.bf16.mxu1 %v1662_v0  ;;  %v1428_v22 = vld [vmem:[#allocation13 + $0xb0] sm:$0xff]   ;;  %v1437_v23 = vld [vmem:[#allocation13 + $0x60] sm:$0xff]   ;;  %v1431_v25 = vld [vmem:[#allocation13 + $0xe8] sm:$0xff]  }
  0x5f   :  { %416 = vmatprep.subr.bf16.mxu0 %v1416_v2  ;;  %473 = vmatprep.subr.bf16.mxu1 %v1422_v8  ;;  %v1438_v24 = vld [vmem:[#allocation13 + $0x20] sm:$0xff]   ;;  %v1432_v26 = vld [vmem:[#allocation13 + $0xa8] sm:$0xff]   ;;  %v1441_v27 = vld [vmem:[#allocation13 + $0x58] sm:$0xff]  }
  0x60   :  { %v1442_v28 = vld [vmem:[#allocation13 + $0x18] sm:$0xff]   ;;  %v1435_v29 = vld [vmem:[#allocation13 + $0xe0] sm:$0xff]   ;;  %v1445_v31 = vld [vmem:[#allocation13 + $0x50] sm:$0xff]  }
  0x61   :  { %v1436_v30 = vld [vmem:[#allocation13 + $0xa0] sm:$0xff]   ;;  %v1446_v32 = vld [vmem:[#allocation13 + $0x10] sm:$0xff]   ;;  %v1439_v33 = vld [vmem:[#allocation13 + $0xd8] sm:$0xff]  }
  0x62   :  { %v1440_v34 = vld [vmem:[#allocation13 + $0x98] sm:$0xff]   ;;  %v1449_v35 = vld [vmem:[#allocation13 + $0x48] sm:$0xff]   ;;  %v1443_v37 = vld [vmem:[#allocation13 + $0xd0] sm:$0xff]  }
  0x63   :  { %v1450_v36 = vld [vmem:[#allocation13 + $0x8] sm:$0xff]   ;;  %v1444_v38 = vld [vmem:[#allocation13 + $0x90] sm:$0xff]   ;;  %v1453_v39 = vld [vmem:[#allocation13 + $0x40] sm:$0xff]  }
  0x64   :  { %1224 = vmatmul.mubr.msk.bf16.vlgmr.msra.gmra.mxu0 %vm144_vm0, %v243_v9  ;;  %1228 = vmatmul.mubr.msk.bf16.vlgmr.msra.gmra.mxu1 %vm144_vm0, %v332_v10  ;;  %v1454_v40 = vld [vmem:[#allocation13] sm:$0xff]   ;;  %v1447_v41 = vld [vmem:[#allocation13 + $0xc8] sm:$0xff]   ;;  %v1455_v45 = vld [vmem:[#allocation13 + $0x178] sm:$0xff]  }
  0x65   :  { %417 = vmatpush1.bf16.msra.mxu0 %v1419_v4  ;;  %474 = vmatpush1.bf16.msra.mxu1 %v1420_v7  ;;  %v1448_v42 = vld [vmem:[#allocation13 + $0x88] sm:$0xff]   ;;  %v1451_v43 = vld [vmem:[#allocation13 + $0xc0] sm:$0xff]   ;;  %v303_v55 = vld [vmem:[%s1783_s6] sm:$0x3] }
  0x66   :  { %434 = vmatprep.mubr.bf16.mxu0 %v1662_v0  ;;  %491 = vmatprep.mubr.bf16.mxu1 %v1662_v0  ;;  %v1452_v44 = vld [vmem:[#allocation13 + $0x80] sm:$0xff]   ;;  %v308_v60 = vrot.slane %v303_v55, %v307_v52  ;;  %v312_v1 = vrot.slane %v303_v55, %v311_v56  ;;  %v1459_v46 = vld [vmem:[#allocation13 + $0x168] sm:$0xff]  }
  0x67   :  { %1304 = vmatprep.subr.bf16.mxu0 %v1423_v11  ;;  %1326 = vmatprep.subr.bf16.mxu1 %v1425_v12  ;;  %v502_v11 = vld [vmem:[%s1783_s6] sm:$0x3]  ;;  %v1460_v47 = vld [vmem:[#allocation13 + $0x128] sm:$0xff]  }
  0x68   :  { %v1467_v55 = vld [vmem:[#allocation13 + $0x148] sm:$0xff]  }
  0x6c   :  { %1231 = vmatmul.mubr.msk.bf16.vlgmr.msra.gmra.mxu0 %vm144_vm0, %v329_v13  ;;  %1234 = vmatmul.mubr.msk.bf16.vlgmr.msra.gmra.mxu1 %vm144_vm0, %v443_v14 }
  0x6d   :  { %1305 = vmatpush3.bf16.msra.mxu0 %v1424_v15  ;;  %1327 = vmatpush3.bf16.msra.mxu1 %v1426_v16 }
  0x6e   :  { %1328 = vmatprep.subr.bf16.mxu1 %v1429_v17  ;;  %1306 = vmatprep.subr.bf16.mxu0 %v1427_v21 }
  0x71   :  { %1329 = vmatpush3.bf16.msra.mxu1 %v1430_v18  ;;  %1307 = vmatpush3.bf16.msra.mxu0 %v1428_v22  ;;  %v507_v18 = vrot.slane %v502_v11, %v307_v52  ;;  %v511_v22 = vrot.slane %v502_v11, %v311_v56  ;;  %v1465_v52 = vld [vmem:[#allocation13 + $0x150] sm:$0xff]   ;;  %v1468_v56 = vld [vmem:[#allocation13 + $0x108] sm:$0xff]  }
  0x72   :  { %1330 = vmatprep.subr.bf16.mxu1 %v1433_v19  ;;  %1308 = vmatprep.subr.bf16.mxu0 %v1431_v25  ;;  %v881_v19 = vld [vmem:[#allocation2 + $0x8] sm:$0x11] }
  0x75   :  { %1331 = vmatpush3.bf16.msra.mxu1 %v1434_v20  ;;  %1309 = vmatpush3.bf16.msra.mxu0 %v1432_v26 }
  0x76   :  { %1332 = vmatprep.subr.bf16.mxu1 %v1437_v23  ;;  %1310 = vmatprep.subr.bf16.mxu0 %v1435_v29 }
  0x79   :  { %1333 = vmatpush3.bf16.msra.mxu1 %v1438_v24  ;;  %1311 = vmatpush3.bf16.msra.mxu0 %v1436_v30 }
  0x7a   :  { %1334 = vmatprep.subr.bf16.mxu1 %v1441_v27  ;;  %1312 = vmatprep.subr.bf16.mxu0 %v1439_v33 }
  0x7d   :  { %1335 = vmatpush3.bf16.msra.mxu1 %v1442_v28  ;;  %1313 = vmatpush3.bf16.msra.mxu0 %v1440_v34 }
  0x7e   :  { %1336 = vmatprep.subr.bf16.mxu1 %v1445_v31  ;;  %1314 = vmatprep.subr.bf16.mxu0 %v1443_v37 }
  0x81   :  { %1337 = vmatpush3.bf16.msra.mxu1 %v1446_v32  ;;  %1315 = vmatpush3.bf16.msra.mxu0 %v1444_v38 }
  0x82   :  { %1338 = vmatprep.subr.bf16.mxu1 %v1449_v35  ;;  %1316 = vmatprep.subr.bf16.mxu0 %v1447_v41 }
  0x85   :  { %1339 = vmatpush3.bf16.msra.mxu1 %v1450_v36  ;;  %1317 = vmatpush3.bf16.msra.mxu0 %v1448_v42 }
  0x86   :  { %1340 = vmatprep.subr.bf16.mxu1 %v1453_v39  ;;  %1318 = vmatprep.subr.bf16.mxu0 %v1451_v43  ;;  %v1457_v43 = vld [vmem:[#allocation13 + $0x170] sm:$0xff]  }
  0x89   :  { %1341 = vmatpush3.bf16.msra.mxu1 %v1454_v40  ;;  %1319 = vmatpush3.bf16.msra.mxu0 %v1452_v44  ;;  %v1456_v40 = vld [vmem:[#allocation13 + $0x138] sm:$0xff]  }
  0x8a   :  { %1348 = vmatprep.subr.bf16.mxu0 %v1455_v45  ;;  %v1458_v45 = vld [vmem:[#allocation13 + $0x130] sm:$0xff]  }
 0x11c   :  { %v182_v48 = vpop.f32.mrf.mxu0  ;;  %v236_v49 = vpop.f32.mrf.mxu1 }
 0x11d   :  { %v237_v59 = vadd.f32 %v236_v49, %v182_v48  ;;  %v1461_v48 = vld [vmem:[#allocation13 + $0x160] sm:$0xff]  }
 0x11e   :  { %v184_v50 = vpop.f32.mrf.mxu0  ;;  %v238_v51 = vpop.f32.mrf.mxu1  ;;  %v1462_v49 = vld [vmem:[#allocation13 + $0x120] sm:$0xff]  }
 0x11f   :  { %v239_v63 = vadd.f32 %v238_v51, %v184_v50  ;;  %v1463_v50 = vld [vmem:[#allocation13 + $0x158] sm:$0xff]  }
 0x120   :  { %v186_v53 = vpop.f32.mrf.mxu0  ;;  %v240_v54 = vpop.f32.mrf.mxu1  ;;  %v1464_v51 = vld [vmem:[#allocation13 + $0x118] sm:$0xff]  }
 0x121   :  { %v1466_v53 = vld [vmem:[#allocation13 + $0x110] sm:$0xff]  }
 0x122   :  { %v187_v57 = vpop.f32.mrf.mxu0  ;;  %v241_v58 = vpop.f32.mrf.mxu1 }
 0x123   :  { %v1469_v57 = vld [vmem:[#allocation13 + $0x140] sm:$0xff]  }
 0x124   :  { %v294_v61 = vpop.f32.mrf.mxu0  ;;  %v382_v62 = vpop.f32.mrf.mxu1 }
 0x125   :  { %v301_v0 = vadd.f32 %v294_v61, %v237_v59  ;;  %v1470_v59 = vld [vmem:[#allocation13 + $0x100] sm:$0xff]  }
 0x126   :  { %v296_v2 = vpop.f32.mrf.mxu0  ;;  %v384_v3 = vpop.f32.mrf.mxu1 }
 0x127   :  { %v315_v4 = vadd.f32 %v308_v60, %v301_v0  ;;  %v302_v5 = vadd.f32 %v296_v2, %v239_v63  ;;  %v1471_v63 = vld [vmem:[#allocation15 + $0x38] sm:$0xff]   ;;  %v1663_v0 = vmov 0.0   ;;  %v1473_v2 = vld [vmem:[#allocation15 + $0x28] sm:$0xff]  }
 0x128   :  { %v298_v6 = vpop.f32.mrf.mxu0  ;;  %v386_v7 = vpop.f32.mrf.mxu1  ;;  %1379 = vmatprep.subr.bf16.mxu1 %v1663_v0 }
 0x129   :  { %v316_v8 = vadd.f32 %v312_v1, %v302_v5  ;;  %v317_v12 = vmax.f32 %v315_v4, 0.0  ;;  %v1472_v1 = vld [vmem:[#allocation15 + $0x30] sm:$0xff]   ;;  %v1475_v4 = vld [vmem:[#allocation15 + $0x18] sm:$0xff]   ;;  %v1477_v6 = vld [vmem:[#allocation15 + $0x8] sm:$0xff]  }
 0x12a   :  { %v299_v9 = vpop.f32.mrf.mxu0  ;;  %v387_v10 = vpop.f32.mrf.mxu1  ;;  %v1476_v5 = vld [vmem:[#allocation15 + $0x10] sm:$0xff]   ;;  %v1478_v7 = vld [vmem:[#allocation15] sm:$0xff]  }
 0x12b   :  { %v318_v13 = vmax.f32 %v316_v8, 0.0  ;;  %v1479_v25 = vpack.c.bf16 %v317_v12, %v317_v12 }
 0x12c   :  { %v436_v14 = vpop.f32.mrf.mxu0  ;;  %v493_v15 = vpop.f32.mrf.mxu1 }
 0x12d   :  { %v1300_v16 = vpack.c.bf16 %v318_v13, %v317_v12  ;;  %v437_v17 = vadd.f32 %v436_v14, %v382_v62  ;;  %v1480_v26 = vpack.c.bf16 %v318_v13, %v318_v13 }
 0x12e   :  { %v438_v20 = vpop.f32.mrf.mxu0  ;;  %v495_v21 = vpop.f32.mrf.mxu1 }
 0x12f   :  { %v500_v23 = vadd.f32 %v493_v15, %v437_v17  ;;  %v439_v24 = vadd.f32 %v438_v20, %v384_v3  ;;  %v1273_v29 = vcombine.high %v1300_v16, %v881_v19  ;;  %872 = vmatprep.mubr.bf16.mxu1 %v1480_v26  ;;  %v1272_v54 = vcombine.low %v1300_v16, %v881_v19  ;;  %v1474_v3 = vld [vmem:[#allocation15 + $0x20] sm:$0xff]  }
 0x130   :  { %v440_v27 = vpop.f32.mrf.mxu0  ;;  %v497_v28 = vpop.f32.mrf.mxu1  ;;  %873 = vmatmul.mubr.bf16.vlgmr.msra.gmra.mxu1 %v1479_v25 }
 0x131   :  { %v514_v30 = vadd.f32 %v507_v18, %v500_v23  ;;  %v501_v31 = vadd.f32 %v495_v21, %v439_v24  ;;  %v933_v34 = vshll.u32 %v1273_v29, 16  ;;  %v931_v41 = vshrl.u32 %v1273_v29, 16  ;;  %1380 = vmatpush3.bf16.msra.mxu1 %v1471_v63  ;;  %1395 = vmatprep.mubr.msk.bf16.mxu1 %vm1664_vm1, %v1663_v0  ;;  %v1291_v29 = vld [vmem:[%s1787_s10] ss:$0 sm:$0xff] }
 0x132   :  { %v441_v32 = vpop.f32.mrf.mxu0  ;;  %v498_v33 = vpop.f32.mrf.mxu1  ;;  %v926_v58 = vshll.u32 %v1272_v54, 16  ;;  %v924_v61 = vshrl.u32 %v1272_v54, 16  ;;  %1381 = vmatprep.subr.bf16.mxu1 %v1663_v0 }
 0x133   :  { %v515_v35 = vadd.f32 %v511_v22, %v501_v31  ;;  %v516_v36 = vmax.f32 %v514_v30, 0.0  ;;  %v935_v38 = vrot.slane %v933_v34, 1  ;;  %v1290_v22 = vld [vmem:[%s1785_s8] ss:$0 sm:$0xff]  ;;  %s1621_s8 = scalar_lea.vmem %s1205_s18, 128 }
 0x134   :  { %v928_v60 = vrot.slane %v926_v58, 1  ;;  %p1622_p7 = scmp.ne.s32.totalorder %s1205_s18, %s1621_s8  ;;  %p1627_p9 = scmp.lt.s32.totalorder %s1621_s8, %s1621_s8 }
 0x135   :  { %v517_v37 = vmax.f32 %v515_v35, 0.0  ;;  %v1302_v42 = vpack.c.bf16 %v516_v36, %v516_v36  ;;  %v936_v44 = vor.u32 %v935_v38, %v931_v41  ;;  %1382 = vmatpush3.bf16.msra.mxu1 %v1472_v1 }
 0x136   :  { %v929_v62 = vor.u32 %v928_v60, %v924_v61  ;;  %1383 = vmatprep.subr.bf16.mxu1 %v1663_v0  ;;  %p1628_p10 = por %p1627_p9, %p1626_p8 }
 0x137   :  { %v1303_v39 = vpack.c.bf16 %v517_v37, %v517_v37 }
 0x138   :  { %p1629_p11 = pnand %p1628_p10, %p1622_p7 }
 0x139   :  { %729 = vmatprep.mubr.bf16.mxu0 %v1303_v39  ;;  %1384 = vmatpush3.bf16.msra.mxu1 %v1473_v2 }
 0x13a   :  { %730 = vmatmul.mubr.bf16.vlgmr.msra.gmra.mxu0 %v1302_v42  ;;  %1385 = vmatprep.subr.bf16.mxu1 %v1663_v0 }
 0x13b   :  { %1349 = vmatpush3.bf16.msra.mxu0 %v1456_v40  ;;  %1067 = vmatprep.mubr.bf16.mxu0 %v936_v44 }
 0x13c   :  { %1350 = vmatprep.subr.bf16.mxu0 %v1457_v43 }
 0x13d   :  { %1386 = vmatpush3.bf16.msra.mxu1 %v1474_v3 }
 0x13e   :  { %1387 = vmatprep.subr.bf16.mxu1 %v1663_v0 }
 0x13f   :  { %1351 = vmatpush3.bf16.msra.mxu0 %v1458_v45 }
 0x140   :  { %1352 = vmatprep.subr.bf16.mxu0 %v1459_v46 }
 0x141   :  { %1388 = vmatpush3.bf16.msra.mxu1 %v1475_v4 }
 0x142   :  { %1389 = vmatprep.subr.bf16.mxu1 %v1663_v0 }
 0x143   :  { %1353 = vmatpush3.bf16.msra.mxu0 %v1460_v47 }
 0x144   :  { %1354 = vmatprep.subr.bf16.mxu0 %v1461_v48 }
 0x145   :  { %1390 = vmatpush3.bf16.msra.mxu1 %v1476_v5 }
 0x146   :  { %1391 = vmatprep.subr.bf16.mxu1 %v1663_v0 }
 0x147   :  { %1355 = vmatpush3.bf16.msra.mxu0 %v1462_v49 }
 0x148   :  { %1356 = vmatprep.subr.bf16.mxu0 %v1463_v50 }
 0x149   :  { %1392 = vmatpush3.bf16.msra.mxu1 %v1477_v6 }
 0x14a   :  { %1393 = vmatprep.subr.bf16.mxu1 %v1663_v0 }
 0x14b   :  { %1357 = vmatpush3.bf16.msra.mxu0 %v1464_v51 }
 0x14c   :  { %1358 = vmatprep.subr.bf16.mxu0 %v1465_v52 }
 0x14d   :  { %1394 = vmatpush3.bf16.msra.mxu1 %v1478_v7 }
 0x14f   :  { %1359 = vmatpush3.bf16.msra.mxu0 %v1466_v53 }
 0x150   :  { %1360 = vmatprep.subr.bf16.mxu0 %v1467_v55 }
 0x153   :  { %1361 = vmatpush3.bf16.msra.mxu0 %v1468_v56 }
 0x154   :  { %1362 = vmatprep.subr.bf16.mxu0 %v1469_v57 }
 0x157   :  { %1363 = vmatpush3.bf16.msra.mxu0 %v1470_v59 }
 0x15a   :  { %1068 = vmatmul.mubr.bf16.vlgmr.msra.gmra.mxu0 %v929_v62 }
 0x1f0   :  { %v1342_v8 = vpop.f32.mrf.mxu1 }
 0x1f2   :  { %v1343_v9 = vpop.f32.mrf.mxu1 }
 0x1f3   :  { %v1344_v18 = vadd.f32 %v1343_v9, %v1342_v8 }
 0x1f4   :  { %v1345_v10 = vpop.f32.mrf.mxu1 }
 0x1f6   :  { %v1346_v11 = vpop.f32.mrf.mxu1 }
 0x1fa   :  { %v1320_v12 = vpop.f32.mrf.mxu0 }
 0x1fc   :  { %v1321_v13 = vpop.f32.mrf.mxu0 }
 0x1fd   :  { %v1322_v16 = vadd.f32 %v1321_v13, %v1320_v12 }
 0x1fe   :  { %v1323_v14 = vpop.f32.mrf.mxu0 }
 0x1ff   :  { %v875_v20 = vadd.f32 %v1344_v18, %v1322_v16 }
 0x200   :  { %v1324_v15 = vpop.f32.mrf.mxu0 }
 0x21a   :  { %v1364_v17 = vpop.f32.mrf.mxu0 }
 0x21c   :  { %v1365_v19 = vpop.f32.mrf.mxu0 }
 0x21d   :  { %v1366_v21 = vadd.f32 %v1365_v19, %v1364_v17 }
 0x21e   :  { %v1367_v23 = vpop.f32.mrf.mxu0 }
 0x21f   :  { %v1075_v24 = vadd.f32 %v1366_v21, %v875_v20 }
 0x220   :  { %v1368_v25 = vpop.f32.mrf.mxu0 }
 0x221   :  { %v1083_v26 = vadd.f32 %v1290_v22, %v1075_v24 }
 0x223   :  { %v1084_v27 = vmax.f32 %v1083_v26, 0.0 }
 0x225   :  { %v1085_v28 = vpack.c.bf16 %v1084_v27, %v1084_v27 }
 0x227   :  { %1396 = vmatmul.mubr.bf16.vlgmr.msra.gmra.mxu1 %v1085_v28 }
 0x2e7   :  { %v1191_v30 = vpop.f32.mrf.mxu1 }
 0x2e8   :  { %v1192_v31 = vadd.f32 %v1291_v29, %v1191_v30 }
 0x2e9   :  { %v1397_v32 = vpop.f32.mrf.mxu1 }
 0x2ea   :  { %1197 = vst [vmem:[#allocation16] sm:$0xff] %v1192_v31 }
 0x2eb   :  { %v1194_v33 = vpop.f32.mrf.mxu1 }
 0x2ec   :  { %1632 = shalt.err (!%p1629_p11)
}
 0x2ed   :  { %1207 = dma.vmem_to_hbm [thread:$0]  %s1205_s18, 128, %s1788_s11, [#allocation6]   ;;  %v1398_v34 = vpop.f32.mrf.mxu1 }
 0x2ee   :  { %1649 = dma.done.wait [#allocation6], 128  }
 0x2ef   :  { %1650 = vsyncadd [#allocation6], 4294967168 }
 0x2f0   :  { %1211 = vsyncpa [#allocation5], 1 }
 0x2f1   :  { %1212 = vsyncpa [#allocation8], 1 }
 0x2f2   :  { %1213 = vsyncpa [#allocation11], 1 }
 0x2f3   :  { %1214 = vsyncpa [#allocation14], 1 }
 0x2f4   :  { %1215 = vsyncpa [#allocation6], 1 }

</bundles_post_ra>
